<compile_context>
chip_gen: v5e
topology: v5e:2x2
jax: 0.10.0
libtpu: 0.0.40
codegen_flags: <defaults>
</compile_context>

<pallas_src>
import math
import functools

import jax
import jax.numpy as jnp
from jax import lax
from jax.experimental import pallas as pl
from jax.experimental.pallas import tpu as pltpu


def _self_attention_kernel(len_ref,      # SMEM scalar-prefetch: [B] int32 valid lengths
                           x_ref,        # VMEM (S, E)  bf16   full sequence of this batch
                           wq_ref,       # VMEM (E, H)  bf16   W_Q
                           wkv_ref,      # VMEM (E, 2H) bf16   fused W_K | W_V
                           o_ref,        # VMEM (TQ, H) f32    query-tile output
                           k_ref,        # VMEM (S, H)  bf16   scratch: K (per batch)
                           v_ref,        # VMEM (S, H)  bf16   scratch: V (per batch)
                           *, head_dim: int, q_tile: int, look_ahead_mask: bool):
    b = pl.program_id(0)
    qi = pl.program_id(1)
    S = x_ref.shape[0]
    H = head_dim

    # K / V projection for the whole sequence: computed once per batch element
    # (first query tile) and cached in VMEM scratch for the remaining tiles.
    @pl.when(qi == 0)
    def _():
        kv = jnp.dot(x_ref[...], wkv_ref[...],
                     preferred_element_type=jnp.float32)          # (S, 2H) f32
        k_ref[...] = kv[:, :H].astype(k_ref.dtype)
        v_ref[...] = kv[:, H:].astype(v_ref.dtype)

    # Q projection only for this query tile.
    if q_tile == S:                       # single tile: static slice, no dyn index
        q_start = 0
        xq = x_ref[...]
    else:
        q_start = pl.multiple_of(qi * q_tile, q_tile)
        xq = x_ref[pl.ds(q_start, q_tile), :]                     # (TQ, E)
    q = jnp.dot(xq, wq_ref[...], preferred_element_type=jnp.float32)  # (TQ, H)

    # Scaled scores: contract last dims directly (no explicit K transpose).
    scale = jnp.float32(1.0 / math.sqrt(H))
    score = lax.dot_general(
        q.astype(jnp.bfloat16), k_ref[...],
        dimension_numbers=(((1,), (1,)), ((), ())),
        preferred_element_type=jnp.float32) * scale                # (TQ, S)

    # Merged padding + causal mask in a single compare/select sweep.
    col = lax.broadcasted_iota(jnp.int32, (q_tile, S), 1)          # key index j
    valid = len_ref[b]
    if look_ahead_mask:
        row = lax.broadcasted_iota(jnp.int32, (q_tile, S), 0) + q_start
        thresh = jnp.minimum(valid, row + 1)                       # (TQ, S)
    else:
        thresh = valid                                             # scalar
    score = jnp.where(col >= thresh, jnp.float32(-1e9), score)

    # Softmax over the key axis (f32), EUP reciprocal for the denominator.
    m = jnp.max(score, axis=-1, keepdims=True)
    e = jnp.exp(score - m)
    denom = jnp.sum(e, axis=-1, keepdims=True)
    attn = e * pl.reciprocal(denom, approx=True)

    # Weighted values (bf16 MXU, f32 accumulation).
    out = jnp.dot(attn.astype(jnp.bfloat16), v_ref[...],
                  preferred_element_type=jnp.float32)              # (TQ, H)
    o_ref[...] = out.astype(o_ref.dtype)


def _pick_q_tile(S: int, target: int = 256) -> int:
    """Largest query-tile that divides S, multiple of 8, capped near `target`."""
    if S <= target:
        return S
    t = (target // 8) * 8
    while t >= 8:
        if S % t == 0:
            return t
        t -= 8
    return S


def self_attention(batch_x, w_q, w_k, w_v, len_chair=None, look_ahead_mask=False):
    """batch_x: [B, S, E] f32; w_q/w_k/w_v: [E, H] f32; len_chair: optional [B] int."""
    B, S, E = batch_x.shape
    H = w_q.shape[1]

    if len_chair is None:
        len_chair = jnp.full((B,), S, dtype=jnp.int32)
    else:
        len_chair = jnp.asarray(len_chair, dtype=jnp.int32)

    # bf16 operands for the MXU (f32 accumulation inside the kernel).
    x_bf16 = batch_x.astype(jnp.bfloat16)
    w_q_b = w_q.astype(jnp.bfloat16)                               # (E, H)
    w_kv = jnp.concatenate([w_k, w_v], axis=1).astype(jnp.bfloat16)  # (E, 2H)

    tq = _pick_q_tile(S)
    n_q = S // tq

    kernel = functools.partial(
        _self_attention_kernel,
        head_dim=H, q_tile=tq, look_ahead_mask=bool(look_ahead_mask))

    grid_spec = pltpu.PrefetchScalarGridSpec(
        num_scalar_prefetch=1,
        grid=(B, n_q),
        in_specs=[
            # Full sequence for this batch (constant across the query-tile axis
            # -> fetched once per batch by the pipeline). Batch dim squeezed.
            pl.BlockSpec((None, S, E), lambda b, qi, lens: (b, 0, 0)),
            # Q weight and fused K|V weight, resident (constant index maps).
            pl.BlockSpec((E, H), lambda b, qi, lens: (0, 0)),
            pl.BlockSpec((E, 2 * H), lambda b, qi, lens: (0, 0)),
        ],
        out_specs=pl.BlockSpec((None, tq, H), lambda b, qi, lens: (b, qi, 0)),
        scratch_shapes=[
            pltpu.VMEM((S, H), jnp.bfloat16),   # K cache (per batch element)
            pltpu.VMEM((S, H), jnp.bfloat16),   # V cache (per batch element)
        ],
    )

    return pl.pallas_call(
        kernel,
        out_shape=jax.ShapeDtypeStruct((B, S, H), jnp.float32),
        grid_spec=grid_spec,
        compiler_params=pltpu.CompilerParams(
            dimension_semantics=("parallel", "arbitrary"),
            vmem_limit_bytes=64 * 1024 * 1024),
    )(len_chair, x_bf16, w_q_b, w_kv)


def self_attention_ref(batch_x, w_q, w_k, w_v, len_chair=None, look_ahead_mask=False):
    """Pure-JAX (f32) reference mirroring the PyTorch forward."""
    B, S, E = batch_x.shape
    H = w_q.shape[1]
    q = batch_x @ w_q
    k = batch_x @ w_k
    v = batch_x @ w_v
    score = q @ jnp.swapaxes(k, -1, -2) / math.sqrt(H)
    col = jnp.arange(S)[None, None, :]
    if len_chair is not None:
        lens = jnp.asarray(len_chair)[:, None, None]
        score = jnp.where(col >= lens, -1e9, score)
    if look_ahead_mask:
        row = jnp.arange(S)[None, :, None]
        score = jnp.where(col > row, -1e9, score)
    attn = jax.nn.softmax(score, axis=-1)
    return attn @ v


if __name__ == "__main__":
    B, S, E, H = 2, 8, 32, 32   # embedding_nums=32, head_embedding_nums=32

    key = jax.random.PRNGKey(0)
    kx, kq, kk, kv = jax.random.split(key, 4)

    batch_x = jax.random.normal(kx, (B, S, E), dtype=jnp.float32)
    # Deterministic init of the three bias-free Linear layers (stored as [E, H]).
    bound = 1.0 / math.sqrt(E)
    w_q = jax.random.uniform(kq, (E, H), jnp.float32, -bound, bound)
    w_k = jax.random.uniform(kk, (E, H), jnp.float32, -bound, bound)
    w_v = jax.random.uniform(kv, (E, H), jnp.float32, -bound, bound)

    len_chair = jnp.array([5, 8], dtype=jnp.int32)

    # Case 1: padding mask + causal (look-ahead) mask.
    out = self_attention(batch_x, w_q, w_k, w_v,
                         len_chair=len_chair, look_ahead_mask=True)
    out = jax.block_until_ready(out)
    ref = self_attention_ref(batch_x, w_q, w_k, w_v,
                             len_chair=len_chair, look_ahead_mask=True)
    assert out.shape == (B, S, H)
    # bf16 matmul inputs (f32 accumulation) -> slightly looser tolerance than pure f32.
    assert jnp.allclose(out, ref, atol=3e-2, rtol=3e-2), "mismatch vs reference (masked)"

    # Case 2: no masks at all.
    out2 = jax.block_until_ready(self_attention(batch_x, w_q, w_k, w_v))
    ref2 = self_attention_ref(batch_x, w_q, w_k, w_v)
    assert jnp.allclose(out2, ref2, atol=3e-2, rtol=3e-2), "mismatch vs reference (unmasked)"

    print("KERNEL_OK")
</pallas_src>

<mosaic_0001>
module attributes {stable_mosaic.version = 11 : i64} {
  func.func @_self_attention_kernel(%arg0: i32, %arg1: i32, %arg2: memref<2xi32, #tpu.memory_space<smem>>, %arg3: memref<1x8x32xbf16, #tpu.memory_space<vmem>>, %arg4: memref<32x32xbf16, #tpu.memory_space<vmem>>, %arg5: memref<32x64xbf16, #tpu.memory_space<vmem>>, %arg6: memref<1x8x32xf32, #tpu.memory_space<vmem>>, %arg7: memref<8x32xbf16, #tpu.memory_space<vmem>>, %arg8: memref<8x32xbf16, #tpu.memory_space<vmem>>) attributes {dimension_semantics = [#tpu.dimension_semantics<parallel>, #tpu.dimension_semantics<arbitrary>], iteration_bounds = array<i64: 2, 1>, scalar_prefetch = 1 : i64, scratch_operands = 2 : i64, tpu.core_type = #tpu.core_type<tc>, window_params = [{transform_indices = @transform_0, window_bounds = array<i64: 1, 8, 32>}, {pipeline_mode = #tpu.pipeline_mode<synchronous>, transform_indices = @transform_1, window_bounds = array<i64: 32, 32>}, {pipeline_mode = #tpu.pipeline_mode<synchronous>, transform_indices = @transform_2, window_bounds = array<i64: 32, 64>}, {transform_indices = @transform_3, window_bounds = array<i64: 1, 8, 32>}]} {
    %c0_i32 = arith.constant 0 : i32
    %0 = arith.cmpi eq, %arg1, %c0_i32 : i32
    %1 = arith.extui %0 : i1 to i32
    %c0_i32_0 = arith.constant 0 : i32
    %2 = arith.cmpi ne, %1, %c0_i32_0 : i32
    scf.if %2 {
      %c0_19 = arith.constant 0 : index
      %c0_20 = arith.constant 0 : index
      %c0_21 = arith.constant 0 : index
      %41 = vector.load %arg3[%c0_19, %c0_20, %c0_21] : memref<1x8x32xbf16, #tpu.memory_space<vmem>>, vector<1x8x32xbf16>
      %42 = vector.shape_cast %41 : vector<1x8x32xbf16> to vector<8x32xbf16>
      %c0_22 = arith.constant 0 : index
      %c0_23 = arith.constant 0 : index
      %43 = vector.load %arg5[%c0_22, %c0_23] : memref<32x64xbf16, #tpu.memory_space<vmem>>, vector<32x64xbf16>
      %cst_24 = arith.constant dense<0.000000e+00> : vector<8x64xf32>
      %44 = tpu.matmul %42, %43, %cst_24 {dimension_numbers = #tpu.dot_dimension_numbers<[1], [0], [0], [1], [0, 0, 1, 1], [], []>} : vector<8x32xbf16>, vector<32x64xbf16>, vector<8x64xf32> -> vector<8x64xf32>
      %45 = vector.extract_strided_slice %44 {offsets = [0, 0], sizes = [8, 32], strides = [1, 1]} : vector<8x64xf32> to vector<8x32xf32>
      %46 = arith.truncf %45 : vector<8x32xf32> to vector<8x32xbf16>
      %c0_25 = arith.constant 0 : index
      %c0_26 = arith.constant 0 : index
      %47 = vector.load %arg7[%c0_25, %c0_26] : memref<8x32xbf16, #tpu.memory_space<vmem>>, vector<8x32xbf16>
      tpu.vector_store %arg7[%c0_25, %c0_26], %46 {strides = array<i32>} : memref<8x32xbf16, #tpu.memory_space<vmem>>, vector<8x32xbf16>,
      %48 = vector.extract_strided_slice %44 {offsets = [0, 32], sizes = [8, 32], strides = [1, 1]} : vector<8x64xf32> to vector<8x32xf32>
      %49 = arith.truncf %48 : vector<8x32xf32> to vector<8x32xbf16>
      %c0_27 = arith.constant 0 : index
      %c0_28 = arith.constant 0 : index
      %50 = vector.load %arg8[%c0_27, %c0_28] : memref<8x32xbf16, #tpu.memory_space<vmem>>, vector<8x32xbf16>
      tpu.vector_store %arg8[%c0_27, %c0_28], %49 {strides = array<i32>} : memref<8x32xbf16, #tpu.memory_space<vmem>>, vector<8x32xbf16>,
    } else {
    }
    %c0 = arith.constant 0 : index
    %c0_1 = arith.constant 0 : index
    %c0_2 = arith.constant 0 : index
    %3 = vector.load %arg3[%c0, %c0_1, %c0_2] : memref<1x8x32xbf16, #tpu.memory_space<vmem>>, vector<1x8x32xbf16>
    %4 = vector.shape_cast %3 : vector<1x8x32xbf16> to vector<8x32xbf16>
    %c0_3 = arith.constant 0 : index
    %c0_4 = arith.constant 0 : index
    %5 = vector.load %arg4[%c0_3, %c0_4] : memref<32x32xbf16, #tpu.memory_space<vmem>>, vector<32x32xbf16>
    %cst = arith.constant dense<0.000000e+00> : vector<8x32xf32>
    %6 = tpu.matmul %4, %5, %cst {dimension_numbers = #tpu.dot_dimension_numbers<[1], [0], [0], [1], [0, 0, 1, 1], [], []>} : vector<8x32xbf16>, vector<32x32xbf16>, vector<8x32xf32> -> vector<8x32xf32>
    %7 = arith.truncf %6 : vector<8x32xf32> to vector<8x32xbf16>
    %c0_5 = arith.constant 0 : index
    %c0_6 = arith.constant 0 : index
    %8 = vector.load %arg7[%c0_5, %c0_6] : memref<8x32xbf16, #tpu.memory_space<vmem>>, vector<8x32xbf16>
    %cst_7 = arith.constant dense<0.000000e+00> : vector<8x8xf32>
    %9 = tpu.matmul %7, %8, %cst_7 {dimension_numbers = #tpu.dot_dimension_numbers<[1], [1], [0], [0], [0, 0, 1, 0], [], []>} : vector<8x32xbf16>, vector<8x32xbf16>, vector<8x8xf32> -> vector<8x8xf32>
    %cst_8 = arith.constant 0.176776692 : f32
    %10 = vector.broadcast %cst_8 : f32 to vector<8x8xf32>
    %11 = arith.mulf %9, %10 : vector<8x8xf32>
    %12 = tpu.iota {dimensions = array<i32: 1>} : vector<8x8xi32>
    %13 = arith.index_cast %arg0 : i32 to index
    %14 = memref.load %arg2[%13] : memref<2xi32, #tpu.memory_space<smem>>
    %15 = tpu.iota {dimensions = array<i32: 0>} : vector<8x8xi32>
    %c0_i32_9 = arith.constant 0 : i32
    %16 = vector.broadcast %c0_i32_9 : i32 to vector<8x8xi32>
    %17 = arith.addi %15, %16 : vector<8x8xi32>
    %c1_i32 = arith.constant 1 : i32
    %18 = vector.broadcast %c1_i32 : i32 to vector<8x8xi32>
    %19 = arith.addi %17, %18 : vector<8x8xi32>
    %20 = vector.broadcast %14 : i32 to vector<8x8xi32>
    %21 = arith.minsi %20, %19 : vector<8x8xi32>
    %22 = arith.cmpi sge, %12, %21 : vector<8x8xi32>
    %cst_10 = arith.constant -1.000000e+09 : f32
    %23 = vector.broadcast %cst_10 : f32 to vector<8x8xf32>
    %24 = arith.select %22, %23, %11 : vector<8x8xi1>, vector<8x8xf32>
    %cst_11 = arith.constant dense<0xFF800000> : vector<8xf32>
    %25 = vector.multi_reduction <maximumf>, %24, %cst_11 [1] : vector<8x8xf32> to vector<8xf32>
    %26 = vector.shape_cast %25 : vector<8xf32> to vector<8x1xf32>
    %27 = vector.broadcast %26 : vector<8x1xf32> to vector<8x8xf32>
    %28 = arith.subf %24, %27 : vector<8x8xf32>
    %29 = math.exp %28 : vector<8x8xf32>
    %cst_12 = arith.constant dense<0.000000e+00> : vector<8xf32>
    %30 = vector.multi_reduction <add>, %29, %cst_12 [1] : vector<8x8xf32> to vector<8xf32>
    %31 = vector.shape_cast %30 : vector<8xf32> to vector<8x1xf32>
    %32 = tpu.reciprocal %31 {approx = true} : vector<8x1xf32> -> vector<8x1xf32>
    %33 = vector.broadcast %32 : vector<8x1xf32> to vector<8x8xf32>
    %34 = arith.mulf %29, %33 : vector<8x8xf32>
    %35 = arith.truncf %34 : vector<8x8xf32> to vector<8x8xbf16>
    %c0_13 = arith.constant 0 : index
    %c0_14 = arith.constant 0 : index
    %36 = vector.load %arg8[%c0_13, %c0_14] : memref<8x32xbf16, #tpu.memory_space<vmem>>, vector<8x32xbf16>
    %cst_15 = arith.constant dense<0.000000e+00> : vector<8x32xf32>
    %37 = tpu.matmul %35, %36, %cst_15 {dimension_numbers = #tpu.dot_dimension_numbers<[1], [0], [0], [1], [0, 0, 1, 1], [], []>} : vector<8x8xbf16>, vector<8x32xbf16>, vector<8x32xf32> -> vector<8x32xf32>
    %c0_16 = arith.constant 0 : index
    %c0_17 = arith.constant 0 : index
    %c0_18 = arith.constant 0 : index
    %38 = vector.load %arg6[%c0_16, %c0_17, %c0_18] : memref<1x8x32xf32, #tpu.memory_space<vmem>>, vector<1x8x32xf32>
    %39 = vector.shape_cast %38 : vector<1x8x32xf32> to vector<8x32xf32>
    %40 = vector.shape_cast %37 : vector<8x32xf32> to vector<1x8x32xf32>
    tpu.vector_store %arg6[%c0_16, %c0_17, %c0_18], %40 {strides = array<i32>} : memref<1x8x32xf32, #tpu.memory_space<vmem>>, vector<1x8x32xf32>,
    return
  }
  func.func @transform_0(%arg0: i32, %arg1: i32, %arg2: memref<2xi32, #tpu.memory_space<smem>>) -> (i32, i32, i32) {
    %c0_i32 = arith.constant 0 : i32
    %c0_i32_0 = arith.constant 0 : i32
    %c0_i32_1 = arith.constant 0 : i32
    return %arg0, %c0_i32, %c0_i32_0 : i32, i32, i32
  }
  func.func @transform_1(%arg0: i32, %arg1: i32, %arg2: memref<2xi32, #tpu.memory_space<smem>>) -> (i32, i32) {
    %c0_i32 = arith.constant 0 : i32
    %c0_i32_0 = arith.constant 0 : i32
    %c0_i32_1 = arith.constant 0 : i32
    return %c0_i32, %c0_i32_0 : i32, i32
  }
  func.func @transform_2(%arg0: i32, %arg1: i32, %arg2: memref<2xi32, #tpu.memory_space<smem>>) -> (i32, i32) {
    %c0_i32 = arith.constant 0 : i32
    %c0_i32_0 = arith.constant 0 : i32
    %c0_i32_1 = arith.constant 0 : i32
    return %c0_i32, %c0_i32_0 : i32, i32
  }
  func.func @transform_3(%arg0: i32, %arg1: i32, %arg2: memref<2xi32, #tpu.memory_space<smem>>) -> (i32, i32, i32) {
    %c0_i32 = arith.constant 0 : i32
    %c0_i32_0 = arith.constant 0 : i32
    return %arg0, %arg1, %c0_i32 : i32, i32, i32
  }
}

</mosaic_0001>

<bundles_post_ra>
// kernel: tpu_custom_call.1
= control target key start
LH: loop header
LB: loop body
LE: loop exit
PB: predicated region body
PF: predicated region fallthrough
CT: control target
= control target key end

     0   :  { %s832_s18 = smov [#allocation5]   ;;  %s1022_s0 = inlined_call_operand.hbm [shape: s32[2], index: 0, kind: input, shape index: {}]   ;;  %s1023_s1 = inlined_call_operand.hbm [shape: bf16[2,8,32], index: 1, kind: input, shape index: {}]   ;;  %s1024_s2 = inlined_call_operand.hbm [shape: bf16[32,32], index: 2, kind: input, shape index: {}]   ;;  %s1025_s3 = inlined_call_operand.hbm [shape: bf16[32,64], index: 3, kind: input, shape index: {}]   ;;  %s1026_s4 = inlined_call_operand.hbm [shape: f32[2,8,32], index: 4, kind: output, shape index: {}]  }
   0x1   :  { %s10_s17 = sshll.u32 %s1022_s0, 4  ;;  %s11_s17 = int_to_ptr.hbm [resolvable:$true] %s10_s17 }
   0x2   :  { %13 = dma.hbm_to_smem %s11_s17, 16, %s832_s18, [#allocation4] }
   0x3   :  { %794 = dma.done.wait [#allocation4], 16 }
   0x4   :  { %795 = vsyncadd [#allocation4], 4294967280 }
   0x5   :  { %16 = sfence }
   0x6   :  { %17 = vsyncpa [#allocation7], 0 }
   0x7   :  { %19 = vsyncpa [#allocation7 + $0x1], 0 }
   0x8   :  { %20 = vsyncpa [#allocation10], 0 }
   0x9   :  { %21 = vsyncpa [#allocation8], 0 }
   0xa   :  { %23 = vsyncpa [#allocation8 + $0x1], 0  ;;  %s866_s19 = smov 0   ;;  %s868_s20 = smov 0  }
   0xb   :  { %s870_s21 = smov 0   ;;  %s872_s22 = smov 0  }
   0xc   :  { %s874_s0 = smov 0   ;;  %s876_s23 = smov 0  }
   0xd LB: > { %s508_s24 = sadd.s32 4294967295, %s830_s23   ;;  %p510_p0 = scmp.ge.s32.totalorder %s830_s23, 1  ;;  %s830_s23 = sphi %s876_s23, %s29_s23   ;;  %s826_s0 = sphi %s874_s0, %s1036_s0   ;;  %s822_s22 = sphi %s872_s22, %s1035_s22   ;;  %s818_s21 = sphi %s870_s21, %s1034_s21   ;;  %s814_s20 = sphi %s868_s20, %s1033_s20   ;;  %s810_s19 = sphi %s866_s19, %s1032_s19  }
   0xe   : > { %p900_p1 = scmp.eq.s32.totalorder %s508_s24, 0  ;;  %p142_p2 = scmp.lt.s32.totalorder %s830_s23, 3 }
   0xf   : > { %s153_s28 = sshll.u32 %s1024_s2, 4  ;;  %s833_s30 = smov [#allocation9]   ;;  %s154_s28 = int_to_ptr.hbm [resolvable:$true] %s153_s28 }
  0x10   : > { %p908_p3 = pnand %p510_p0, %p142_p2  ;;  %s155_s5 = sshll.u32 %s833_s30, 4  ;;  %s156_s5 = int_to_ptr.vmem [resolvable:$true] %s155_s5 }
  0x11   : > { %p513_p6 = scmp.ge.s32.totalorder %s830_s23, 2  ;;  %s167_s8 = sshll.u32 %s1025_s3, 4  ;;  %s168_s8 = int_to_ptr.hbm [resolvable:$true] %s167_s8 }
  0x12   : > { %p561_p4 = pneg %p908_p3  ;;  %s834_s9 = smov 64  }
  0x13   : > { %s835_s10 = smov 4   ;;  %s836_s11 = smov [#allocation11]  }
  0x14   : > { %p562_p5 = pnand %p561_p4, %p900_p1  ;;  %s169_s12 = sshll.u32 %s836_s11, 4  ;;  %s170_s12 = int_to_ptr.vmem [resolvable:$true] %s169_s12 }
  0x15   : > { %s41_s13 = sadd.s32 1, %s826_s0  ;;  %s509_s14 = sadd.s32 4294967294, %s830_s23  }
  0x16   : > { %564 = dma.hbm_to_vmem [thread:$0]  (!%p562_p5), %s154_s28, 256, %s156_s5, [#allocation10], %s834_s9, %s834_s9, %s835_s10  }
  0x17   : > { %567 = dma.hbm_to_vmem [thread:$0]  (!%p562_p5), %s168_s8, 256, %s170_s12, [#allocation10], %s834_s9, %s834_s9, %s835_s10  }
  0x18   : > { %p43_p7 = scmp.ge.s32.totalorder %s41_s13, 2  ;;  %s48_s15 = sadd.s32 1, %s818_s21 }
  0x19   : > { %p55_p8 = scmp.ne.s32.totalorder %s818_s21, %s814_s20  ;;  %p56_p9 = scmp.eq.s32.totalorder %s830_s23, 0 }
  0x1a   : > { %s1038_s13 = smov (%p43_p7, %s41_s13), 0  ;;  %p61_p10 = scmp.ne.s32.totalorder %s814_s20, %s810_s19 }
  0x1b   : > { %s45_s16 = ssub.s32 %s826_s0, %s1038_s13  ;;  %p129_p11 = scmp.eq.s32.totalorder %s508_s24, 1 }
  0x1c   : > { %p46_p12 = scmp.eq.s32.totalorder %s45_s16, 0  ;;  %p936_p13 = por %p900_p1, %p61_p10 }
  0x1d   : > { %p940_p0 = por %p129_p11, %p55_p8  ;;  %p135_p2 = scmp.eq.s32.totalorder %s509_s14, 1 }
  0x1e   : > { %s945_s26 = scalar_select %p46_p12, %s818_s21, %s48_s15  }
  0x1f   : > { %p57_p4 = por %p56_p9, %p55_p8  ;;  %p947_p5 = por %p135_p2, %p61_p10 }
  0x20   : > { %s183_s28 = sand.u32 1, %s818_s21   ;;  %s515_s24 = sshll.u32 %s826_s0, 2 }
  0x21   : > { %p578_p7 = scmp.lt.s32.totalorder %s830_s23, 2  ;;  %s514_s30 = sshll.u32 %s183_s28, 2 }
  0x22   : > { %s191_s7 = scalar_lea.hbm %s1023_s1, %s515_s24  ;;  %s187_s9 = scalar_lea.vmem [#allocation6], %s514_s30 }
  0x23   : > { %s193_s8 = sshll.u32 %s191_s7, 4  ;;  %s195_s10 = sshll.u32 %s187_s9, 4  ;;  %s194_s8 = int_to_ptr.hbm [resolvable:$true] %s193_s8  ;;  %s196_s10 = int_to_ptr.vmem [resolvable:$true] %s195_s10 }
  0x24   : > { %p569_p11 = pnand %p578_p7, %p57_p4  ;;  %s184_s11 = scalar_lea.sflag [#allocation7], %s183_s28 }
  0x25   : > { %204 = sbr.rel (%p908_p3) target bundleno = 728 (0x2d8), region = 32  ;;  %s960_s12 = sand.u32 (!%p908_p3), 1, %s814_s20  }
  0x26   : > { %571 = dma.hbm_to_vmem [thread:$0]  (!%p569_p11), %s194_s8, 64, %s196_s10, %s184_s11  }
  0x27   : > { %s517_s14 = sshll.u32 (!%p908_p3), %s960_s12, 2  ;;  %s207_s15 = scalar_lea.sflag (!%p908_p3), [#allocation7], %s960_s12 }
  0x28   : > { %s210_s16 = scalar_lea.vmem (!%p908_p3), [#allocation6], %s517_s14 }
  0x2a   : > { %797 = dma.done.wait (%p936_p13), %s207_s15, 64  }
  0x2b   : > { %799 = vsyncadd (%p936_p13), %s207_s15, 4294967232 }
  0x2c   : > { %801 = dma.done.wait (%p900_p1), [#allocation10], 512  }
  0x2d   : > { %803 = vsyncadd (%p900_p1), [#allocation10], 4294966784  ;;  %v546_v0 = vld [vmem:[#allocation11 + $0x8] sm:$0xff]  ;;  %v548_v1 = vld [vmem:[#allocation9 + $0x8] sm:$0xff]  ;;  %vm266_vm0 = vcmask 261120   ;;  %vm284_vm1 = vcmask 257024   ;;  %v347_v14 = vlaneseq }
  0x2e   : > { %276 = vmatpush.bf16.msra.mxu0 %v546_v0  ;;  %v545_v2 = vld [vmem:[#allocation11] sm:$0xff]  ;;  %318 = vmatpush.bf16.msra.mxu1 %v548_v1  ;;  %v547_v3 = vld [vmem:[#allocation9] sm:$0xff]  ;;  %v249_v4 = vld [vmem:[%s210_s16] sm:$0xf]  ;;  %s349_s25 = sld [smem:[#allocation5 + %s822_s22]]  ;;  %vm358_vm4 = vcmask 64512  }
  0x2f   : > { %v291_v5 = vld [vmem:[%s210_s16] sm:$0xf]  ;;  %v351_v15 = vshrl.u32 %v347_v14, 7  ;;  %v348_v18 = vand.u32 127, %v347_v14  ;;  %s837_s29 = smov 96   ;;  %vm375_vm5 = vcmask 1043456  }
  0x30   : > { %s542_s17 = sshll.u32 %s822_s22, 3  ;;  %s520_s28 = sshll.u32 %s960_s12, 3 }
  0x31   : > { %v352_v16 = vadd.s32 1, %v351_v15  ;;  %s405_s5 = scalar_lea.hbm %s1026_s4, %s542_s17  ;;  %s243_s6 = scalar_lea.vmem [#allocation12], %s520_s28 }
  0x32   : > { %277 = vmatpush.bf16.msra.mxu0 %v545_v2  ;;  %319 = vmatpush.bf16.msra.mxu1 %v547_v3  ;;  %s407_s7 = sshll.u32 %s243_s6, 4  ;;  %s409_s8 = sshll.u32 %s405_s5, 4  ;;  %s408_s7 = int_to_ptr.vmem [resolvable:$true] %s407_s7  ;;  %s410_s8 = int_to_ptr.hbm [resolvable:$true] %s409_s8 }
  0x33   : > { %s394_s9 = scalar_lea.sflag [#allocation8], %s960_s12  ;;  %s756_s10 = sshra.s32 %s410_s8, 4  ;;  %s757_s10 = int_to_ptr.hbm [resolvable:$true] %s756_s10 }
  0x34   : > { %v353_v17 = vstv %s349_s25  ;;  %s758_s11 = scalar_lea.hbm %s757_s10, 8  ;;  %s762_s15 = scalar_lea.hbm %s1026_s4, 16 }
  0x35   : > { %529 = vmatmul.msk.bf16.vlgmr.msra.gmra.mxu0 %vm266_vm0, %v249_v4  ;;  %538 = vmatmul.msk.bf16.vlgmr.msra.gmra.mxu1 %vm266_vm0, %v291_v5  ;;  %vm354_vm2 = vcmp.lt.s32.totalorder %v353_v17, %v352_v16  ;;  %p759_p1 = scmp.ne.s32.totalorder %s757_s10, %s758_s11  ;;  %p763_p9 = scmp.lt.s32.totalorder %s757_s10, %s1026_s4 }
  0x36   : > { %v355_v19 = vsel %vm354_vm2, %v353_v17, %v352_v16  ;;  %p764_p10 = scmp.lt.s32.totalorder %s762_s15, %s758_s11 }
  0x37   : > { %vm356_vm3 = vcmp.ge.s32.totalorder %v348_v18, %v355_v19  ;;  %p760_p3 = pnand %p759_p1, %p940_p0 }
  0x38   : > { %p765_p12 = por %p764_p10, %p763_p9 }
  0x39   : > { %p761_p8 = pneg %p760_p3 }
  0x3b   : > { %p766_p13 = pnand %p765_p12, %p761_p8 }
  0xb2   : > { %v279_v6 = vpop.f32.mrf.mxu0  ;;  %v321_v8 = vpop.f32.mrf.mxu1 }
  0xb3   : > { %v283_v7 = vpack.c.bf16 %v279_v6, %v279_v6  ;;  %v325_v13 = vpack.c.bf16 %v321_v8, %v321_v8 }
  0xb5   : > { %285 = vst.msk [vmem:[#allocation2] sm:$0xf] %vm284_vm1, %v283_v7 }
  0xba   : > { %v281_v9 = vpop.f32.mrf.mxu0  ;;  %v323_v10 = vpop.f32.mrf.mxu1 }
  0xbc   : > { %v326_v11 = vld [vmem:[#allocation2] sm:$0xf] }
  0xbd   : > { %v331_v12 = vsel %vm266_vm0, %v326_v11, 0 }
  0xbe   : > { %340 = vmatpush.bf16.xpose.msra.mxu2 %v331_v12 }
  0xc5   : > { %539 = vmatmul.msk.bf16.vlgmr.msra.gmra.mxu2 %vm266_vm0, %v325_v13 }
 0x148   : > { %v342_v20 = vpop.f32.mrf.mxu2 }
 0x149   : > { %v346_v21 = vmul.f32 0.17677669, %v342_v20 }
 0x14b   : > { %v357_v22 = vsel %vm356_vm3, -1e+09, %v346_v21 }
 0x14c   : > { %v359_v23 = vsel %vm358_vm4, %v357_v22, -inf }
 0x14d   : > { %360 = vmax.xlane.f32.xlu0 %v359_v23 }
 0x150   : > { %v344_v24 = vpop.f32.mrf.mxu2 }
 0x161   : > { %287 = vrot.lane.b32.xlu0 %v283_v7, %s837_s29 }
 0x1c0   : > { %v361_v25 = vpop.xlane.xlu0 %360 }
 0x1c1   : > { %v362_v26 = vsub.f32 %v357_v22, %v361_v25 }
 0x1c3   : > { %v363_v27 = vmul.f32 1.442695, %v362_v26 }
 0x1c5   : > { %636 = vpow2.f32 %v363_v27 }
 0x1cb   : > { %v637_v28 = vpop.eup %636 }
 0x1cc   : > { %v365_v29 = vsel %vm358_vm4, %v637_v28, 0.0 }
 0x1cd   : > { %366 = vadd.xlane.f32.xlu1 %v365_v29 }
 0x1d3   : > { %v288_v30 = vpop.permute.xlu0 %287 }
 0x1d4   : > { %290 = vst.msk [vmem:[#allocation3] sm:$0xf] %vm284_vm1, %v288_v30 }
 0x1db   : > { %v371_v31 = vld [vmem:[#allocation3] sm:$0xf] }
 0x1dc   : > { %v377_v32 = vsel %vm375_vm5, %v371_v31, 0 }
 0x1dd   : > { %386 = vmatpush.bf16.msra.mxu3 %v377_v32 }
 0x240   : > { %v367_v33 = vpop.xlane.xlu1 %366 }
 0x241   : > { %638 = vrcp.f32 %v367_v33 }
 0x247   : > { %v639_v34 = vpop.eup %638 }
 0x248   : > { %v369_v35 = vmul.f32 %v639_v34, %v637_v28 }
 0x24a   : > { %v370_v36 = vpack.c.bf16 %v369_v35, %v369_v35 }
 0x24c   : > { %540 = vmatmul.msk.bf16.vlgmr.msra.gmra.mxu3 %vm358_vm4, %v370_v36 }
 0x2cf   : > { %v388_v37 = vpop.f32.mrf.mxu3 }
 0x2d0   : > { %392 = vst.msk [vmem:[%s243_s6] sm:$0xff] %vm266_vm0, %v388_v37 }
 0x2d1   : > { %769 = shalt.err (!%p766_p13)
}
 0x2d2   : > { %559 = dma.vmem_to_hbm [thread:$0]  (%p940_p0), %s408_s7, 128, %s410_s8, %s394_s9  }
 0x2d7   : > { %v390_v38 = vpop.f32.mrf.mxu3 }
 0x2d8 PF: > { %s421_s12 = sand.u32 1, %s810_s19   ;;  %p573_p2 = pnand %p513_p6, %p947_p5 }
 0x2d9   : > { %s422_s29 = scalar_lea.sflag [#allocation8], %s421_s12 }
 0x2da   : > { %p574_p4 = pneg %p573_p2 }
 0x2dc   : > { %805 = dma.done.wait (%p574_p4), %s422_s29, 128  }
 0x2dd   : > { %807 = vsyncadd (%p574_p4), %s422_s29, 4294967168  ;;  %s29_s23 = sadd.s32 1, %s830_s23   ;;  %s1032_s19 = smov %s814_s20 }
 0x2de   : > { %p26_p7 = scmp.ge.s32.totalorder %s29_s23, 4   ;;  %s1033_s20 = smov %s818_s21 }
 0x2df   : > { %s1034_s21 = smov %s945_s26  ;;  %s1035_s22 = smov %s826_s0 }
 0x2e0   : > { %s1036_s0 = smov %s1038_s13  ;;  %28 = sbr.rel (!%p26_p7) target bundleno = 13 (0xd), region = 89 }
 0x2e5   :  { %428 = vsyncpa [#allocation7], 1 }
 0x2e6   :  { %430 = vsyncpa [#allocation7 + $0x1], 1 }
 0x2e7   :  { %431 = vsyncpa [#allocation10], 1 }
 0x2e8   :  { %432 = vsyncpa [#allocation8], 1 }
 0x2e9   :  { %434 = vsyncpa [#allocation8 + $0x1], 1 }

</bundles_post_ra>
